<compile_context>
chip_gen: v5e
topology: v5e:2x2
jax: 0.10.0
libtpu: 0.0.40
codegen_flags: <defaults>
</compile_context>

<pallas_src>
import functools

import jax
import jax.numpy as jnp
from jax import lax
from jax.experimental import pallas as pl
from jax.experimental.pallas import tpu as pltpu

EPS = 1e-5


# --------------------------------------------------------------------------
# Helpers
# --------------------------------------------------------------------------
def _round_up(v, m):
    return ((v + m - 1) // m) * m


def _cdiv(a, b):
    return (a + b - 1) // b


def _vmem_capacity():
    try:
        return pltpu.get_tpu_info().vmem_capacity_bytes
    except Exception:
        return 128 << 20


def _vmem_limit_bytes(per_step_bytes):
    cap = _vmem_capacity()
    # Leave ample headroom below physical VMEM (v7x: 64 MiB -> ~40 MiB cap,
    # v5e/v6e: 128 MiB -> 80 MiB cap).
    hard = min(int(cap * 5 // 8), 96 << 20)
    want = int(per_step_bytes) + (4 << 20)
    return int(min(max(want, 16 << 20), hard))


def _tile_budget_bytes():
    cap = _vmem_capacity()
    return max(16 << 20, min(cap * 3 // 8, 48 << 20))


def _pick_tile_rows(n, bytes_per_row, cap_rows=1024):
    """Largest row tile fitting the VMEM budget, balanced over the grid."""
    t = max(8, _tile_budget_bytes() // max(bytes_per_row, 1))
    t = (t // 8) * 8
    t = min(t, cap_rows)
    if t >= n:
        return n                      # single tile == full dim (layout escape)
    g = max(1, _cdiv(n, t))
    t = _round_up(_cdiv(n, g), 8)     # balance tiles -> no wasteful tail tile
    return min(t, n)


# --------------------------------------------------------------------------
# Pass 1: BN batch statistics (sum, sum-of-squares over the batch dimension)
# --------------------------------------------------------------------------
def _bn_stats_kernel(x_ref, sum_ref, sumsq_ref, *, bn_start, tile_n, n_true,
                     tiles_per_split, needs_mask):
    @pl.when(pl.program_id(1) == 0)
    def _():
        sum_ref[...] = jnp.zeros_like(sum_ref)
        sumsq_ref[...] = jnp.zeros_like(sumsq_ref)

    xb = x_ref[...]
    if bn_start:                       # fallback path: full row streamed
        xb = xb[:, bn_start:]
    xb = xb.astype(jnp.float32)        # (tile_n, cb)

    if needs_mask:
        # Mask rows past the true batch size (ragged tail / clamped tiles).
        t = pl.program_id(0) * tiles_per_split + pl.program_id(1)
        row = t * tile_n + lax.broadcasted_iota(jnp.int32, (tile_n, 1), 0)
        xb = jnp.where(row < n_true, xb, 0.0)

    sum_ref[...] += jnp.sum(xb, axis=0)[None, None, :]
    sumsq_ref[...] += jnp.sum(xb * xb, axis=0)[None, None, :]


# --------------------------------------------------------------------------
# Pass 2: row-local normalization (LN on first half, affine BN on second)
# --------------------------------------------------------------------------
def _lbn1d_norm_kernel(x_ref, ln_w_ref, ln_b_ref, bn_scale_ref, bn_shift_ref,
                       o_ref, *, ch, inv_half, eps):
    x = x_ref[...].astype(jnp.float32)                    # (tile_n, C)
    x1 = x[:, :ch]
    x2 = x[:, ch:]

    # LayerNorm half: mean, then centered variance (better conditioned).
    mu = jnp.sum(x1, axis=1, keepdims=True) * inv_half
    d = x1 - mu
    var = jnp.sum(d * d, axis=1, keepdims=True) * inv_half
    y1 = d * lax.rsqrt(var + eps) * ln_w_ref[...] + ln_b_ref[...]

    # BatchNorm half: batch stats hoisted -> per-channel scale/shift only.
    y2 = x2 * bn_scale_ref[...] + bn_shift_ref[...]

    o_ref[:, :ch] = y1.astype(o_ref.dtype)
    o_ref[:, ch:] = y2.astype(o_ref.dtype)


# --------------------------------------------------------------------------
# Wrapper
# --------------------------------------------------------------------------
def lbn_1d(x, ln_w, ln_b, bn_w, bn_b, *, half, eps=EPS):
    """x: (N, C); ln_w/ln_b: (half,); bn_w/bn_b: (C-half,)."""
    n, c = x.shape
    ch = half
    cb = c - half
    assert ch > 0 and cb > 0
    assert ln_w.shape == (ch,) and ln_b.shape == (ch,)
    assert bn_w.shape == (cb,) and bn_b.shape == (cb,)
    dsize = jnp.dtype(x.dtype).itemsize

    # ---------------- Pass 1: BN batch stats (Pallas reduction) -------------
    # Stream only the BN half when the split is 128-lane aligned; otherwise
    # stream the full row and slice in-kernel (correct, slightly more traffic).
    bn_aligned = (cb % 128 == 0) and (ch % cb == 0)
    stream_w = cb if bn_aligned else c
    col_block = (ch // cb) if bn_aligned else 0
    bn_start = 0 if bn_aligned else ch

    tile_s = _pick_tile_rows(n, 2 * stream_w * dsize)
    total_tiles = _cdiv(n, tile_s)
    num_splits = 2 if total_tiles >= 2 else 1   # one split per TC on v7x
    tiles_per_split = _cdiv(total_tiles, num_splits)
    needs_mask = (num_splits * tiles_per_split * tile_s != n)

    def _stats_x_map(p, i):
        t = jnp.minimum(p * tiles_per_split + i, total_tiles - 1)
        return (t, col_block)

    stats_kernel = functools.partial(
        _bn_stats_kernel, bn_start=bn_start, tile_n=tile_s, n_true=n,
        tiles_per_split=tiles_per_split, needs_mask=needs_mask)

    s, s2 = pl.pallas_call(
        stats_kernel,
        out_shape=(jax.ShapeDtypeStruct((num_splits, 1, cb), jnp.float32),
                   jax.ShapeDtypeStruct((num_splits, 1, cb), jnp.float32)),
        grid=(num_splits, tiles_per_split),
        in_specs=[pl.BlockSpec((tile_s, stream_w), _stats_x_map)],
        out_specs=(pl.BlockSpec((1, 1, cb), lambda p, i: (p, 0, 0)),
                   pl.BlockSpec((1, 1, cb), lambda p, i: (p, 0, 0))),
        compiler_params=pltpu.CompilerParams(
            dimension_semantics=("parallel", "arbitrary"),
            vmem_limit_bytes=_vmem_limit_bytes(4 * tile_s * stream_w * dsize)),
    )(x)

    # Tiny per-channel glue (XLA): fold BN stats + affine into scale/shift.
    # Divide by the TRUE batch size (masked rows contribute zero).
    s = jnp.sum(s, axis=0)                         # (1, cb)
    s2 = jnp.sum(s2, axis=0)
    bmu = s / n
    bvar = jnp.maximum(s2 / n - bmu * bmu, 0.0)    # biased training-mode variance
    bn_scale = bn_w.reshape(1, cb).astype(jnp.float32) * lax.rsqrt(bvar + eps)
    bn_shift = bn_b.reshape(1, cb).astype(jnp.float32) - bmu * bn_scale

    ln_w2 = ln_w.reshape(1, ch).astype(jnp.float32)
    ln_b2 = ln_b.reshape(1, ch).astype(jnp.float32)

    # ---------------- Pass 2: row-tiled normalization, one (N,C) in/out -----
    tile_n = _pick_tile_rows(n, 4 * c * max(dsize, 4))
    grid = (_cdiv(n, tile_n),)

    norm_kernel = functools.partial(_lbn1d_norm_kernel, ch=ch,
                                    inv_half=1.0 / ch, eps=eps)
    out = pl.pallas_call(
        norm_kernel,
        out_shape=jax.ShapeDtypeStruct((n, c), x.dtype),
        grid=grid,
        in_specs=[
            pl.BlockSpec((tile_n, c), lambda i: (i, 0)),   # x stream
            pl.BlockSpec((1, ch), lambda i: (0, 0)),       # ln_w  (resident)
            pl.BlockSpec((1, ch), lambda i: (0, 0)),       # ln_b  (resident)
            pl.BlockSpec((1, cb), lambda i: (0, 0)),       # bn_scale (resident)
            pl.BlockSpec((1, cb), lambda i: (0, 0)),       # bn_shift (resident)
        ],
        out_specs=pl.BlockSpec((tile_n, c), lambda i: (i, 0)),
        compiler_params=pltpu.CompilerParams(
            dimension_semantics=("parallel",),
            vmem_limit_bytes=_vmem_limit_bytes(4 * tile_n * c * max(dsize, 4))),
    )(x, ln_w2, ln_b2, bn_scale, bn_shift)

    return out


# --------------------------------------------------------------------------
# Pure-JAX reference (PyTorch semantics: LayerNorm + training-mode BatchNorm1d)
# --------------------------------------------------------------------------
def lbn_1d_ref(x, ln_w, ln_b, bn_w, bn_b, *, half, eps=EPS):
    x1, x2 = x[:, :half], x[:, half:]
    mu = x1.mean(axis=1, keepdims=True)
    var = ((x1 - mu) ** 2).mean(axis=1, keepdims=True)
    y1 = (x1 - mu) / jnp.sqrt(var + eps) * ln_w + ln_b
    bmu = x2.mean(axis=0, keepdims=True)
    bvar = ((x2 - bmu) ** 2).mean(axis=0, keepdims=True)   # biased batch var
    y2 = (x2 - bmu) / jnp.sqrt(bvar + eps) * bn_w + bn_b
    return jnp.concatenate([y1, y2], axis=1)


if __name__ == "__main__":
    key = jax.random.PRNGKey(0)

    def _check(n, c, half):
        ks = jax.random.split(jax.random.fold_in(key, n * 1009 + c), 5)
        x = jax.random.normal(ks[0], (n, c), dtype=jnp.float32)
        # PyTorch defaults are ones/zeros; perturb to exercise the affines.
        ln_w = jnp.ones((half,), jnp.float32) + 0.1 * jax.random.normal(ks[1], (half,))
        ln_b = 0.1 * jax.random.normal(ks[2], (half,))
        bn_w = jnp.ones((c - half,), jnp.float32) + 0.1 * jax.random.normal(ks[3], (c - half,))
        bn_b = 0.1 * jax.random.normal(ks[4], (c - half,))

        out = jax.block_until_ready(lbn_1d(x, ln_w, ln_b, bn_w, bn_b, half=half))
        ref = lbn_1d_ref(x, ln_w, ln_b, bn_w, bn_b, half=half)
        assert out.shape == ref.shape
        assert jnp.allclose(out, ref, atol=2e-5, rtol=2e-5), \
            f"mismatch vs reference for shape ({n},{c}) half={half}"

    _check(8, 32, 16)       # small demo shape (non-lane-aligned fallback path)
    _check(64, 256, 128)    # 128-lane-aligned fast path (column-block pass 1)
    print("KERNEL_OK")
</pallas_src>

<mosaic_0001>
module attributes {stable_mosaic.version = 11 : i64} {
  func.func @_bn_stats_kernel(%arg0: i32, %arg1: i32, %arg2: memref<8x32xf32, #tpu.memory_space<vmem>>, %arg3: memref<1x1x16xf32, #tpu.memory_space<vmem>>, %arg4: memref<1x1x16xf32, #tpu.memory_space<vmem>>) attributes {dimension_semantics = [#tpu.dimension_semantics<parallel>, #tpu.dimension_semantics<arbitrary>], iteration_bounds = array<i64: 1, 1>, scalar_prefetch = 0 : i64, scratch_operands = 0 : i64, tpu.core_type = #tpu.core_type<tc>, window_params = [{transform_indices = @transform_0, window_bounds = array<i64: 8, 32>}, {transform_indices = @transform_1, window_bounds = array<i64: 1, 1, 16>}, {transform_indices = @transform_2, window_bounds = array<i64: 1, 1, 16>}]} {
    %c0_i32 = arith.constant 0 : i32
    %0 = arith.cmpi eq, %arg1, %c0_i32 : i32
    %1 = arith.extui %0 : i1 to i32
    %c0_i32_0 = arith.constant 0 : i32
    %2 = arith.cmpi ne, %1, %c0_i32_0 : i32
    scf.if %2 {
      %cst_15 = arith.constant 0.000000e+00 : f32
      %16 = vector.broadcast %cst_15 : f32 to vector<1x1x16xf32>
      %c0_16 = arith.constant 0 : index
      %c0_17 = arith.constant 0 : index
      %c0_18 = arith.constant 0 : index
      %17 = vector.load %arg3[%c0_16, %c0_17, %c0_18] : memref<1x1x16xf32, #tpu.memory_space<vmem>>, vector<1x1x16xf32>
      tpu.vector_store %arg3[%c0_16, %c0_17, %c0_18], %16 {strides = array<i32>} : memref<1x1x16xf32, #tpu.memory_space<vmem>>, vector<1x1x16xf32>,
      %cst_19 = arith.constant 0.000000e+00 : f32
      %18 = vector.broadcast %cst_19 : f32 to vector<1x1x16xf32>
      %c0_20 = arith.constant 0 : index
      %c0_21 = arith.constant 0 : index
      %c0_22 = arith.constant 0 : index
      %19 = vector.load %arg4[%c0_20, %c0_21, %c0_22] : memref<1x1x16xf32, #tpu.memory_space<vmem>>, vector<1x1x16xf32>
      tpu.vector_store %arg4[%c0_20, %c0_21, %c0_22], %18 {strides = array<i32>} : memref<1x1x16xf32, #tpu.memory_space<vmem>>, vector<1x1x16xf32>,
    } else {
    }
    %c0 = arith.constant 0 : index
    %c0_1 = arith.constant 0 : index
    %3 = vector.load %arg2[%c0, %c0_1] : memref<8x32xf32, #tpu.memory_space<vmem>>, vector<8x32xf32>
    %4 = vector.extract_strided_slice %3 {offsets = [0, 16], sizes = [8, 16], strides = [1, 1]} : vector<8x32xf32> to vector<8x16xf32>
    %c0_2 = arith.constant 0 : index
    %c0_3 = arith.constant 0 : index
    %c0_4 = arith.constant 0 : index
    %5 = vector.load %arg3[%c0_2, %c0_3, %c0_4] : memref<1x1x16xf32, #tpu.memory_space<vmem>>, vector<1x1x16xf32>
    %cst = arith.constant dense<0.000000e+00> : vector<16xf32>
    %6 = vector.multi_reduction <add>, %4, %cst [0] : vector<8x16xf32> to vector<16xf32>
    %7 = vector.shape_cast %6 : vector<16xf32> to vector<1x1x16xf32>
    %8 = arith.addf %5, %7 : vector<1x1x16xf32>
    %c0_5 = arith.constant 0 : index
    %c0_6 = arith.constant 0 : index
    %c0_7 = arith.constant 0 : index
    %9 = vector.load %arg3[%c0_5, %c0_6, %c0_7] : memref<1x1x16xf32, #tpu.memory_space<vmem>>, vector<1x1x16xf32>
    tpu.vector_store %arg3[%c0_5, %c0_6, %c0_7], %8 {strides = array<i32>} : memref<1x1x16xf32, #tpu.memory_space<vmem>>, vector<1x1x16xf32>,
    %c0_8 = arith.constant 0 : index
    %c0_9 = arith.constant 0 : index
    %c0_10 = arith.constant 0 : index
    %10 = vector.load %arg4[%c0_8, %c0_9, %c0_10] : memref<1x1x16xf32, #tpu.memory_space<vmem>>, vector<1x1x16xf32>
    %11 = arith.mulf %4, %4 : vector<8x16xf32>
    %cst_11 = arith.constant dense<0.000000e+00> : vector<16xf32>
    %12 = vector.multi_reduction <add>, %11, %cst_11 [0] : vector<8x16xf32> to vector<16xf32>
    %13 = vector.shape_cast %12 : vector<16xf32> to vector<1x1x16xf32>
    %14 = arith.addf %10, %13 : vector<1x1x16xf32>
    %c0_12 = arith.constant 0 : index
    %c0_13 = arith.constant 0 : index
    %c0_14 = arith.constant 0 : index
    %15 = vector.load %arg4[%c0_12, %c0_13, %c0_14] : memref<1x1x16xf32, #tpu.memory_space<vmem>>, vector<1x1x16xf32>
    tpu.vector_store %arg4[%c0_12, %c0_13, %c0_14], %14 {strides = array<i32>} : memref<1x1x16xf32, #tpu.memory_space<vmem>>, vector<1x1x16xf32>,
    return
  }
  func.func @transform_0(%arg0: i32, %arg1: i32) -> (i32, i32) {
    %c1_i32 = arith.constant 1 : i32
    %0 = arith.muli %arg0, %c1_i32 : i32
    %1 = arith.addi %0, %arg1 : i32
    %c0_i32 = arith.constant 0 : i32
    %2 = arith.minsi %1, %c0_i32 : i32
    %c0_i32_0 = arith.constant 0 : i32
    %c0_i32_1 = arith.constant 0 : i32
    return %2, %c0_i32_0 : i32, i32
  }
  func.func @transform_1(%arg0: i32, %arg1: i32) -> (i32, i32, i32) {
    %c0_i32 = arith.constant 0 : i32
    %c0_i32_0 = arith.constant 0 : i32
    %c0_i32_1 = arith.constant 0 : i32
    return %arg0, %c0_i32, %c0_i32_0 : i32, i32, i32
  }
  func.func @transform_2(%arg0: i32, %arg1: i32) -> (i32, i32, i32) {
    %c0_i32 = arith.constant 0 : i32
    %c0_i32_0 = arith.constant 0 : i32
    %c0_i32_1 = arith.constant 0 : i32
    return %arg0, %c0_i32, %c0_i32_0 : i32, i32, i32
  }
}

</mosaic_0001>

<bundles_post_ra>
// kernel: tpu_custom_call.1
= control target key start
LH: loop header
LB: loop body
LE: loop exit
PB: predicated region body
PF: predicated region fallthrough
CT: control target
= control target key end

     0   :  { %8 = vsyncpa [#allocation3], 0  ;;  %s224_s0 = inlined_call_operand.hbm [shape: f32[8,32], index: 0, kind: input, shape index: {}]   ;;  %s225_s1 = inlined_call_operand.hbm [shape: f32[1,1,16], index: 1, kind: output, shape index: {0}]   ;;  %s226_s2 = inlined_call_operand.hbm [shape: f32[1,1,16], index: 2, kind: output, shape index: {1}]  }
   0x1   :  { %9 = vsyncpa [#allocation4], 0 }
   0x2   :  { %10 = vsyncpa [#allocation7], 0  ;;  %s21_s11 = sshll.u32 %s224_s0, 4  ;;  %s191_s12 = smov [#allocation2]   ;;  %s22_s11 = int_to_ptr.hbm [resolvable:$true] %s21_s11 }
   0x3   :  { %s23_s13 = sshll.u32 %s191_s12, 4  ;;  %s24_s13 = int_to_ptr.vmem [resolvable:$true] %s23_s13 }
   0x4   :  { %26 = dma.hbm_to_vmem [thread:$0]  %s22_s11, 128, %s24_s13, [#allocation3]  }
   0x5   :  { %185 = dma.done.wait [#allocation3], 128  }
   0x6   :  { %186 = vsyncadd [#allocation3], 4294967168  ;;  %vm38_vm0 = vcmask 122880   ;;  %v192_v0 = vmov 0.0   ;;  %vm43_vm1 = vcmask 261248   ;;  %v41_v1 = vld [vmem:[#allocation2] sm:$0xff] }
   0x7   :  { %39 = vst.msk [vmem:[#allocation5] sm:$0x1] %vm38_vm0, %v192_v0  ;;  %v44_v2 = vsel %vm43_vm1, %v41_v1, 0.0  ;;  %v59_v3 = vmul.f32 %v41_v1, %v41_v1  ;;  %s193_s0 = smov 112   ;;  %s194_s14 = smov [#allocation5]  }
   0x8   :  { %40 = vst.msk [vmem:[#allocation6] sm:$0x1] %vm38_vm0, %v192_v0  ;;  %v45_v4 = vrot.slane %v44_v2, 4  ;;  %s78_s15 = sshll.u32 %s194_s14, 4  ;;  %s80_s18 = sshll.u32 %s225_s1, 4  ;;  %s79_s15 = int_to_ptr.vmem [resolvable:$true] %s78_s15  ;;  %s81_s18 = int_to_ptr.hbm [resolvable:$true] %s80_s18 }
   0x9   :  { %v60_v5 = vsel %vm43_vm1, %v59_v3, 0.0  ;;  %s195_s19 = smov [#allocation6]   ;;  %s91_s23 = sshll.u32 %s226_s2, 4  ;;  %s92_s23 = int_to_ptr.hbm [resolvable:$true] %s91_s23 }
   0xa   :  { %v46_v6 = vadd.f32 %v45_v4, %v44_v2  ;;  %v61_v7 = vrot.slane %v60_v5, 4  ;;  %s89_s20 = sshll.u32 %s195_s19, 4  ;;  %s90_s20 = int_to_ptr.vmem [resolvable:$true] %s89_s20 }
   0xc   :  { %v47_v8 = vrot.slane %v46_v6, 2  ;;  %v62_v9 = vadd.f32 %v61_v7, %v60_v5 }
   0xe   :  { %v48_v10 = vadd.f32 %v47_v8, %v46_v6  ;;  %v63_v11 = vrot.slane %v62_v9, 2  ;;  %v42_v17 = vld [vmem:[#allocation5] sm:$0x1] }
   0xf   :  { %v58_v20 = vld [vmem:[#allocation6] sm:$0x1] }
  0x10   :  { %v49_v12 = vrot.slane %v48_v10, 1  ;;  %v64_v13 = vadd.f32 %v63_v11, %v62_v9 }
  0x12   :  { %v50_v14 = vadd.f32 %v49_v12, %v48_v10  ;;  %v65_v15 = vrot.slane %v64_v13, 1 }
  0x14   :  { %52 = vrot.lane.b32.xlu0 %v50_v14, %s193_s0  ;;  %v66_v16 = vadd.f32 %v65_v15, %v64_v13 }
  0x1c   :  { %68 = vrot.lane.b32.xlu0 %v66_v16, %s193_s0 }
  0x86   :  { %v53_v18 = vpop.permute.xlu0 %52 }
  0x87   :  { %v55_v19 = vadd.f32 %v53_v18, %v42_v17 }
  0x89   :  { %57 = vst.msk [vmem:[#allocation5] sm:$0x1] %vm38_vm0, %v55_v19 }
  0x8a   :  { %83 = dma.vmem_to_hbm [thread:$0]  %s79_s15, 16, %s81_s18, [#allocation4]  }
  0x8e   :  { %v69_v21 = vpop.permute.xlu0 %68 }
  0x8f   :  { %v71_v22 = vadd.f32 %v69_v21, %v58_v20 }
  0x91   :  { %72 = vst.msk [vmem:[#allocation6] sm:$0x1] %vm38_vm0, %v71_v22 }
  0x92   :  { %94 = dma.vmem_to_hbm [thread:$0]  %s90_s20, 16, %s92_s23, [#allocation7]  }
  0x93   :  { %187 = dma.done.wait [#allocation4], 16  }
  0x94   :  { %188 = vsyncadd [#allocation4], 4294967280 }
  0x95   :  { %189 = dma.done.wait [#allocation7], 16  }
  0x96   :  { %190 = vsyncadd [#allocation7], 4294967280 }
  0x97   :  { %103 = vsyncpa [#allocation3], 1 }
  0x98   :  { %104 = vsyncpa [#allocation4], 1 }
  0x99   :  { %105 = vsyncpa [#allocation7], 1 }

</bundles_post_ra>
